<compile_context>
chip_gen: v7x
topology: tpu7x:2x2x1
jax: 0.10.0
libtpu: 0.0.40
codegen_flags: <defaults>
</compile_context>

<pallas_src>
import jax
import jax.numpy as jnp
from jax import lax
from jax.experimental import pallas as pl
from jax.experimental.pallas import tpu as pltpu


def _make_kernel(TR, F, V, E):
    def kernel(x_ref, v_ref, off_ref, w_ref, o_ref):
        # x_ref:   (TR, F)      int32 raw per-field indices
        # v_ref:   (TR, F)      f32   per-(row, field) weights
        # off_ref: (1, F)       int32 cumulative field offsets
        # w_ref:   (F*V, F*E)   f32   block-diagonal embedding table
        # o_ref:   (TR, F*E)    f32   lane-dense output block
        idx = x_ref[...] + off_ref[...]                  # (TR, F)
        vals = v_ref[...]                                # (TR, F)

        # Scaled one-hot over the block-diagonal column space: column
        # c = f*V + v is `vals[:, f]` iff v == idx[:, f].  Built with full
        # (TR, F*V)-wide compares/selects (VPU) -- no concatenate, no
        # unaligned lane offsets.
        iota_c = lax.broadcasted_iota(jnp.int32, (TR, F * V), 1)
        oh = jnp.zeros((TR, F * V), jnp.float32)
        for f in range(F):
            hit = (iota_c == (idx[:, f:f + 1] + f * V)).astype(jnp.float32)
            oh = oh + hit * vals[:, f:f + 1]

        # Single MXU matmul: (TR, F*V) @ (F*V, F*E) -> (TR, F*E).
        o_ref[...] = jnp.dot(oh, w_ref[...],
                             precision=lax.Precision.HIGHEST,
                             preferred_element_type=jnp.float32)

    return kernel


def features_embedding_forward(x, values, weight, offsets, *, row_tile=None):
    """Fused `values.unsqueeze(-1) * embedding(x + offsets)`.

    x:       (B, S, F) integer field indices
    values:  (B, S, F) float weights
    weight:  (V, E)    embedding table, V = sum(field_dims)
    offsets: (F,)      cumulative field offsets
    returns: (B, S, F, E) float32
    """
    B, S, F = x.shape
    V, E = weight.shape
    R = B * S

    if row_tile is None:
        row_tile = R if R <= 512 else 512
    TR = row_tile
    assert R % TR == 0, "row count must divide evenly into row tiles"

    x2d = x.reshape(R, F).astype(jnp.int32)
    v2d = values.reshape(R, F).astype(jnp.float32)
    off2d = jnp.asarray(offsets, jnp.int32).reshape(1, F)

    # Block-diagonal repack of the table: w_bd[f*V + v, f*E + e] = weight[v, e].
    eye_f = jnp.eye(F, dtype=jnp.float32)
    w_bd = jnp.einsum('fg,ve->fvge', eye_f, weight.astype(jnp.float32))
    w_bd = w_bd.reshape(F * V, F * E)

    kernel = _make_kernel(TR, F, V, E)

    out2d = pl.pallas_call(
        kernel,
        out_shape=jax.ShapeDtypeStruct((R, F * E), jnp.float32),
        grid_spec=pltpu.PrefetchScalarGridSpec(
            num_scalar_prefetch=0,
            grid=(R // TR,),
            in_specs=[
                pl.BlockSpec((TR, F), lambda i: (i, 0)),
                pl.BlockSpec((TR, F), lambda i: (i, 0)),
                pl.BlockSpec((1, F), lambda i: (0, 0)),
                pl.BlockSpec((F * V, F * E), lambda i: (0, 0)),
            ],
            out_specs=pl.BlockSpec((TR, F * E), lambda i: (i, 0)),
        ),
        compiler_params=pltpu.CompilerParams(
            dimension_semantics=("parallel",)),
    )(x2d, v2d, off2d, w_bd)

    return out2d.reshape(B, S, F, E)


def _reference(x, values, weight, offsets):
    # Pure-JAX reference matching the PyTorch module.
    idx = x + jnp.asarray(offsets, x.dtype).reshape((1,) * (x.ndim - 1) + (-1,))
    emb = weight[idx]                                   # (B, S, F, E)
    return values[..., None] * emb


if __name__ == "__main__":
    key = jax.random.PRNGKey(0)
    k_x, k_v, k_w = jax.random.split(key, 3)

    # Small shapes consistent with the module: 4 fields, embed_dim 32.
    field_dims = (5, 7, 3, 11)
    B, S, F, E = 2, 8, len(field_dims), 32
    V = sum(field_dims)

    # offsets = (0, *cumsum(field_dims)[:-1])
    offs = [0]
    for d in field_dims[:-1]:
        offs.append(offs[-1] + d)
    offsets = jnp.asarray(offs, jnp.int32)

    # Per-field indices in [0, field_dims[f]).
    maxs = jnp.asarray(field_dims, jnp.int32)
    x = jax.random.randint(k_x, (B, S, F), 0, 2 ** 30, dtype=jnp.int32) % maxs
    values = jax.random.normal(k_v, (B, S, F), jnp.float32)

    # Xavier-uniform embedding table (eval-time parameter).
    bound = (6.0 / (V + E)) ** 0.5
    weight = jax.random.uniform(k_w, (V, E), jnp.float32, -bound, bound)

    out = features_embedding_forward(x, values, weight, offsets)
    out = jax.block_until_ready(out)

    ref = jax.block_until_ready(_reference(x, values, weight, offsets))
    assert out.shape == (B, S, F, E)
    assert jnp.allclose(out, ref, rtol=1e-4, atol=1e-4), (
        float(jnp.max(jnp.abs(out - ref))))

    print("KERNEL_OK")
</pallas_src>

<mosaic_0001>
module attributes {stable_mosaic.version = 11 : i64} {
  func.func @kernel(%arg0: i32, %arg1: memref<16x4xi32, #tpu.memory_space<vmem>>, %arg2: memref<16x4xf32, #tpu.memory_space<vmem>>, %arg3: memref<1x4xi32, #tpu.memory_space<vmem>>, %arg4: memref<104x128xf32, #tpu.memory_space<vmem>>, %arg5: memref<16x128xf32, #tpu.memory_space<vmem>>) attributes {dimension_semantics = [#tpu.dimension_semantics<parallel>], iteration_bounds = array<i64: 1>, scalar_prefetch = 0 : i64, scratch_operands = 0 : i64, tpu.core_type = #tpu.core_type<tc>, window_params = [{transform_indices = @transform_0, window_bounds = array<i64: 16, 4>}, {transform_indices = @transform_1, window_bounds = array<i64: 16, 4>}, {pipeline_mode = #tpu.pipeline_mode<synchronous>, transform_indices = @transform_2, window_bounds = array<i64: 1, 4>}, {pipeline_mode = #tpu.pipeline_mode<synchronous>, transform_indices = @transform_3, window_bounds = array<i64: 104, 128>}, {transform_indices = @transform_4, window_bounds = array<i64: 16, 128>}]} {
    %c0 = arith.constant 0 : index
    %c0_0 = arith.constant 0 : index
    %0 = vector.load %arg1[%c0, %c0_0] : memref<16x4xi32, #tpu.memory_space<vmem>>, vector<16x4xi32>
    %c0_1 = arith.constant 0 : index
    %c0_2 = arith.constant 0 : index
    %1 = vector.load %arg3[%c0_1, %c0_2] : memref<1x4xi32, #tpu.memory_space<vmem>>, vector<1x4xi32>
    %2 = vector.broadcast %1 : vector<1x4xi32> to vector<16x4xi32>
    %3 = arith.addi %0, %2 : vector<16x4xi32>
    %c0_3 = arith.constant 0 : index
    %c0_4 = arith.constant 0 : index
    %4 = vector.load %arg2[%c0_3, %c0_4] : memref<16x4xf32, #tpu.memory_space<vmem>>, vector<16x4xf32>
    %5 = tpu.iota {dimensions = array<i32: 1>} : vector<16x104xi32>
    %cst = arith.constant 0.000000e+00 : f32
    %6 = vector.broadcast %cst : f32 to vector<16x104xf32>
    %7 = vector.extract_strided_slice %3 {offsets = [0, 0], sizes = [16, 1], strides = [1, 1]} : vector<16x4xi32> to vector<16x1xi32>
    %c0_i32 = arith.constant 0 : i32
    %8 = vector.broadcast %c0_i32 : i32 to vector<16x1xi32>
    %9 = arith.addi %7, %8 : vector<16x1xi32>
    %10 = vector.broadcast %9 : vector<16x1xi32> to vector<16x104xi32>
    %11 = arith.cmpi eq, %5, %10 : vector<16x104xi32>
    %12 = arith.extui %11 : vector<16x104xi1> to vector<16x104xi32>
    %13 = arith.sitofp %12 : vector<16x104xi32> to vector<16x104xf32>
    %14 = vector.extract_strided_slice %4 {offsets = [0, 0], sizes = [16, 1], strides = [1, 1]} : vector<16x4xf32> to vector<16x1xf32>
    %15 = vector.broadcast %14 : vector<16x1xf32> to vector<16x104xf32>
    %16 = arith.mulf %13, %15 : vector<16x104xf32>
    %17 = arith.addf %6, %16 : vector<16x104xf32>
    %18 = vector.extract_strided_slice %3 {offsets = [0, 1], sizes = [16, 1], strides = [1, 1]} : vector<16x4xi32> to vector<16x1xi32>
    %c26_i32 = arith.constant 26 : i32
    %19 = vector.broadcast %c26_i32 : i32 to vector<16x1xi32>
    %20 = arith.addi %18, %19 : vector<16x1xi32>
    %21 = vector.broadcast %20 : vector<16x1xi32> to vector<16x104xi32>
    %22 = arith.cmpi eq, %5, %21 : vector<16x104xi32>
    %23 = arith.extui %22 : vector<16x104xi1> to vector<16x104xi32>
    %24 = arith.sitofp %23 : vector<16x104xi32> to vector<16x104xf32>
    %25 = vector.extract_strided_slice %4 {offsets = [0, 1], sizes = [16, 1], strides = [1, 1]} : vector<16x4xf32> to vector<16x1xf32>
    %26 = vector.broadcast %25 : vector<16x1xf32> to vector<16x104xf32>
    %27 = arith.mulf %24, %26 : vector<16x104xf32>
    %28 = arith.addf %17, %27 : vector<16x104xf32>
    %29 = vector.extract_strided_slice %3 {offsets = [0, 2], sizes = [16, 1], strides = [1, 1]} : vector<16x4xi32> to vector<16x1xi32>
    %c52_i32 = arith.constant 52 : i32
    %30 = vector.broadcast %c52_i32 : i32 to vector<16x1xi32>
    %31 = arith.addi %29, %30 : vector<16x1xi32>
    %32 = vector.broadcast %31 : vector<16x1xi32> to vector<16x104xi32>
    %33 = arith.cmpi eq, %5, %32 : vector<16x104xi32>
    %34 = arith.extui %33 : vector<16x104xi1> to vector<16x104xi32>
    %35 = arith.sitofp %34 : vector<16x104xi32> to vector<16x104xf32>
    %36 = vector.extract_strided_slice %4 {offsets = [0, 2], sizes = [16, 1], strides = [1, 1]} : vector<16x4xf32> to vector<16x1xf32>
    %37 = vector.broadcast %36 : vector<16x1xf32> to vector<16x104xf32>
    %38 = arith.mulf %35, %37 : vector<16x104xf32>
    %39 = arith.addf %28, %38 : vector<16x104xf32>
    %40 = vector.extract_strided_slice %3 {offsets = [0, 3], sizes = [16, 1], strides = [1, 1]} : vector<16x4xi32> to vector<16x1xi32>
    %c78_i32 = arith.constant 78 : i32
    %41 = vector.broadcast %c78_i32 : i32 to vector<16x1xi32>
    %42 = arith.addi %40, %41 : vector<16x1xi32>
    %43 = vector.broadcast %42 : vector<16x1xi32> to vector<16x104xi32>
    %44 = arith.cmpi eq, %5, %43 : vector<16x104xi32>
    %45 = arith.extui %44 : vector<16x104xi1> to vector<16x104xi32>
    %46 = arith.sitofp %45 : vector<16x104xi32> to vector<16x104xf32>
    %47 = vector.extract_strided_slice %4 {offsets = [0, 3], sizes = [16, 1], strides = [1, 1]} : vector<16x4xf32> to vector<16x1xf32>
    %48 = vector.broadcast %47 : vector<16x1xf32> to vector<16x104xf32>
    %49 = arith.mulf %46, %48 : vector<16x104xf32>
    %50 = arith.addf %39, %49 : vector<16x104xf32>
    %c0_5 = arith.constant 0 : index
    %c0_6 = arith.constant 0 : index
    %51 = vector.load %arg4[%c0_5, %c0_6] : memref<104x128xf32, #tpu.memory_space<vmem>>, vector<104x128xf32>
    %cst_7 = arith.constant dense<0.000000e+00> : vector<16x128xf32>
    %52 = tpu.matmul %50, %51, %cst_7 {dimension_numbers = #tpu.dot_dimension_numbers<[1], [0], [0], [1], [0, 0, 1, 1], [], []>, precision = #tpu.contract_precision<fp32>} : vector<16x104xf32>, vector<104x128xf32>, vector<16x128xf32> -> vector<16x128xf32>
    %c0_8 = arith.constant 0 : index
    %c0_9 = arith.constant 0 : index
    %53 = vector.load %arg5[%c0_8, %c0_9] : memref<16x128xf32, #tpu.memory_space<vmem>>, vector<16x128xf32>
    tpu.vector_store %arg5[%c0_8, %c0_9], %52 {strides = array<i32>} : memref<16x128xf32, #tpu.memory_space<vmem>>, vector<16x128xf32>,
    return
  }
  func.func @transform_0(%arg0: i32) -> (i32, i32) {
    %c0_i32 = arith.constant 0 : i32
    %c0_i32_0 = arith.constant 0 : i32
    return %arg0, %c0_i32 : i32, i32
  }
  func.func @transform_1(%arg0: i32) -> (i32, i32) {
    %c0_i32 = arith.constant 0 : i32
    %c0_i32_0 = arith.constant 0 : i32
    return %arg0, %c0_i32 : i32, i32
  }
  func.func @transform_2(%arg0: i32) -> (i32, i32) {
    %c0_i32 = arith.constant 0 : i32
    %c0_i32_0 = arith.constant 0 : i32
    %c0_i32_1 = arith.constant 0 : i32
    return %c0_i32, %c0_i32_0 : i32, i32
  }
  func.func @transform_3(%arg0: i32) -> (i32, i32) {
    %c0_i32 = arith.constant 0 : i32
    %c0_i32_0 = arith.constant 0 : i32
    %c0_i32_1 = arith.constant 0 : i32
    return %c0_i32, %c0_i32_0 : i32, i32
  }
  func.func @transform_4(%arg0: i32) -> (i32, i32) {
    %c0_i32 = arith.constant 0 : i32
    %c0_i32_0 = arith.constant 0 : i32
    return %arg0, %c0_i32 : i32, i32
  }
}

</mosaic_0001>

<bundles_post_ra>
// kernel: tpu_custom_call.1
= control target key start
LH: loop header
LB: loop body
LE: loop exit
PB: predicated region body
PF: predicated region fallthrough
CT: control target
= control target key end

     0   :  { %9 = vsyncpa [#allocation3], 0  ;;  %s1656_s0 = inlined_call_operand.vmem [shape: s32[16,4], index: 0, kind: input, shape index: {}]   ;;  %s1657_s1 = inlined_call_operand.vmem [shape: f32[16,4], index: 1, kind: input, shape index: {}]   ;;  %s1658_s2 = inlined_call_operand.vmem [shape: s32[1,4], index: 2, kind: input, shape index: {}]   ;;  %s1659_s3 = inlined_call_operand.hbm [shape: f32[104,128], index: 3, kind: input, shape index: {}]   ;;  %s1660_s4 = inlined_call_operand.hbm [shape: f32[16,128], index: 4, kind: output, shape index: {}]  }
   0x1   :  { %10 = vsyncpa [#allocation4], 0  ;;  %s1331_s15 = smov [#allocation2]   ;;  %s1283_s19 = scalar_lea.hbm %s1659_s3, 1664 }
   0x2   :  { %s22_s16 = sshll.u32 %s1331_s15, 4  ;;  %p1284_p0 = scmp.ne.s32.totalorder %s1659_s3, %s1283_s19  ;;  %s23_s16 = int_to_ptr.vmem [resolvable:$true] %s22_s16 }
   0x3   :  { %p1287_p1 = scmp.lt.u32.totalorder %s1283_s19, %s1659_s3 }
   0x5   :  { %p1289_p2 = pnand %p1287_p1, %p1284_p0 }
   0x7   :  { %1292 = shalt.err (!%p1289_p2)
}
   0x8   :  { %s1293_s24 = scalar_lea.vmem %s23_s16, 1664  ;;  %p1298_p4 = scmp.lt.s32.totalorder %s23_s16, %s23_s16 }
   0x9   :  { %p1294_p3 = scmp.ne.s32.totalorder %s23_s16, %s1293_s24  ;;  %p1299_p5 = scmp.lt.s32.totalorder %s1293_s24, %s1293_s24 }
   0xb   :  { %p1300_p6 = por %p1299_p5, %p1298_p4 }
   0xd   :  { %p1301_p7 = pnand %p1300_p6, %p1294_p3 }
   0xf   :  { %1304 = shalt.err (!%p1301_p7)
}
  0x10   :  { %s1332_s25 = smov 128   ;;  %s1333_s26 = smov 8  }
  0x11   :  { %28 = dma.hbm_to_vmem [thread:$0]  %s1659_s3, 1664, %s23_s16, [#allocation3], %s1332_s25, %s1332_s25, %s1333_s26  }
  0x12   :  { %1327 = dma.done.wait [#allocation3], 1664  }
  0x13   :  { %1328 = vsyncadd [#allocation3], 4294965632  ;;  %v1334_v0 = vmov 1   ;;  %v1335_v1 = vmov 0   ;;  %v1383_v2 = vld [vmem:[%s1657_s1] sm:$0xff]  ;;  %v33_v3 = vld [vmem:[%s1656_s0 + $0x8] sm:$0xff] }
  0x14   :  { %1270 = vset.pattern.permute.xlu0 %v1334_v0  ;;  %1269 = vset.pattern.permute.xlu1 %v1335_v1  ;;  %v833_v4 = vld [vmem:[%s1658_s2] ss:$0 sm:$0xff]  ;;  %v1399_v11 = vld [vmem:[%s1657_s1 + $0x8] sm:$0xff]  ;;  %v1336_v12 = vmov 2   ;;  %v1404_v15 = vld [vmem:[#allocation2] sm:$0xff]  ;;  %v1337_v19 = vmov 3  }
  0x15   :  { %86 = vperm.xlu0 %1270, %v1383_v2   ;;  %59 = vperm.xlu1 %1269, %v1383_v2   ;;  %v40_v5 = vadd.s32 %v833_v4, %v33_v3  ;;  %v32_v6 = vld [vmem:[%s1656_s0] sm:$0xff]  ;;  %v1406_v16 = vld [vmem:[#allocation2 + $0x8] sm:$0xff]  ;;  %v170_v17 = vand.u32 4294901760, %v1404_v15  ;;  %v1414_v23 = vld [vmem:[#allocation2 + $0x18] sm:$0xff]  ;;  %vm162_vm8 = vcmask 850944   ;;  %s1339_s0 = smov [#allocation5]  }
  0x16   :  { %v39_v7 = vadd.s32 %v833_v4, %v32_v6  ;;  %v173_v18 = vand.u32 4294901760, %v1406_v16  ;;  %v1412_v22 = vld [vmem:[#allocation2 + $0x10] sm:$0xff]  ;;  %v179_v25 = vand.u32 4294901760, %v1414_v23  ;;  %v1428_v27 = vld [vmem:[#allocation2 + $0x20] sm:$0xff]  ;;  %v1430_v28 = vld [vmem:[#allocation2 + $0x28] sm:$0xff]  ;;  %s821_s1 = sshll.u32 %s1339_s0, 4  ;;  %s822_s1 = int_to_ptr.vmem [resolvable:$true] %s821_s1 }
  0x17   :  { %v72_v8 = vadd.s32 26, %v40_v5  ;;  %v98_v13 = vadd.s32 52, %v40_v5  ;;  %v124_v14 = vadd.s32 78, %v40_v5  ;;  %v176_v24 = vand.u32 4294901760, %v1412_v22  ;;  %v1445_v32 = vld [vmem:[#allocation2 + $0x30] sm:$0xff]  ;;  %v1447_v33 = vld [vmem:[#allocation2 + $0x38] sm:$0xff]  ;;  %p1310_p9 = scmp.lt.s32.totalorder %s822_s1, %s822_s1 }
  0x18   :  { %v71_v9 = vadd.s32 26, %v39_v7  ;;  %v97_v10 = vadd.s32 52, %v39_v7  ;;  %v123_v20 = vadd.s32 78, %v39_v7  ;;  %v1410_v21 = vpack.c.bf16 %v173_v18, %v170_v17  ;;  %v1457_v37 = vld [vmem:[#allocation2 + $0x40] sm:$0xff]  ;;  %v1459_v38 = vld [vmem:[#allocation2 + $0x48] sm:$0xff]  ;;  %v1474_v42 = vld [vmem:[#allocation2 + $0x50] sm:$0xff] }
  0x19   :  { %1271 = vset.pattern.permute.xlu0 %v1335_v1  ;;  %49 = vperm.xlu1 %1269, %v40_v5   ;;  %v1425_v26 = vpack.c.bf16 %v179_v25, %v176_v24  ;;  %v182_v29 = vand.u32 4294901760, %v1428_v27  ;;  %v185_v30 = vand.u32 4294901760, %v1430_v28  ;;  %v188_v34 = vand.u32 4294901760, %v1445_v32  ;;  %v1476_v43 = vld [vmem:[#allocation2 + $0x58] sm:$0xff]  ;;  %v1500_v49 = vld [vmem:[#allocation2 + $0x60] sm:$0xff]  ;;  %s1305_s11 = scalar_lea.vmem %s822_s1, 256 }
  0x1a   :  { %46 = vperm.xlu0 %1271, %v39_v7   ;;  %1179 = vmatprep.subr.bf16.mxu0 %v1410_v21  ;;  %v191_v35 = vand.u32 4294901760, %v1447_v33  ;;  %v194_v39 = vand.u32 4294901760, %v1457_v37  ;;  %v197_v40 = vand.u32 4294901760, %v1459_v38  ;;  %v200_v44 = vand.u32 4294901760, %v1474_v42  ;;  %p1306_p8 = scmp.ne.s32.totalorder %s822_s1, %s1305_s11  ;;  %p1311_p10 = scmp.lt.s32.totalorder %s1305_s11, %s1305_s11 }
  0x1b   :  { %1107 = vmatprep.subr.bf16.mxu1 %v1410_v21  ;;  %1181 = vmatpush3.bf16.msra.mxu0 %v1410_v21  ;;  %v1441_v31 = vpack.c.bf16 %v185_v30, %v182_v29  ;;  %v203_v45 = vand.u32 4294901760, %v1476_v43  ;;  %v1494_v47 = vsub.f32 %v1404_v15, %v170_v17  ;;  %v1497_v48 = vsub.f32 %v1406_v16, %v173_v18 }
  0x1c   :  { %1109 = vmatpush3.bf16.msra.mxu1 %v1410_v21  ;;  %1183 = vmatprep.subr.bf16.mxu0 %v1425_v26  ;;  %v1454_v36 = vpack.c.bf16 %v191_v35, %v188_v34  ;;  %v1471_v41 = vpack.c.bf16 %v197_v40, %v194_v39  ;;  %v1503_v50 = vand.u32 4294901760, %v1500_v49  ;;  %v283_v56 = vsub.f32 %v1412_v22, %v176_v24  ;;  %p1312_p11 = por %p1311_p10, %p1310_p9 }
  0x1d   :  { %1274 = vset.pattern.permute.xlu1 %v1334_v0  ;;  %1111 = vmatprep.subr.bf16.mxu1 %v1425_v26  ;;  %v1488_v46 = vpack.c.bf16 %v203_v45, %v200_v44  ;;  %v270_v51 = vand.u32 4294901760, %v1494_v47  ;;  %v277_v52 = vand.u32 4294901760, %v1497_v48  ;;  %v290_v57 = vsub.f32 %v1414_v23, %v179_v25 }
  0x1e   :  { %77 = vperm.xlu1 %1274, %v72_v8   ;;  %1272 = vset.pattern.permute.xlu0 %v1334_v0  ;;  %v284_v60 = vand.u32 4294901760, %v283_v56  ;;  %v304_v3 = vsub.f32 %v1430_v28, %v185_v30  ;;  %v325_v22 = vsub.f32 %v1457_v37, %v194_v39  ;;  %v332_v24 = vsub.f32 %v1459_v38, %v197_v40  ;;  %p1313_p12 = pnand %p1312_p11, %p1306_p8 }
  0x1f   :  { %74 = vperm.xlu0 %1272, %v71_v9   ;;  %1185 = vmatpush3.bf16.msra.mxu0 %v1425_v26  ;;  %v1509_v53 = vpack.c.bf16 %v277_v52, %v270_v51  ;;  %v271_v54 = vsub.f32 %v1494_v47, %v270_v51  ;;  %v278_v55 = vsub.f32 %v1497_v48, %v277_v52  ;;  %v291_v61 = vand.u32 4294901760, %v290_v57 }
  0x20   :  { %1113 = vmatpush3.bf16.msra.mxu1 %v1425_v26  ;;  %1187 = vmatprep.subr.bf16.mxu0 %v1441_v31  ;;  %v305_v7 = vand.u32 4294901760, %v304_v3  ;;  %v311_v9 = vsub.f32 %v1445_v32, %v188_v34  ;;  %v326_v28 = vand.u32 4294901760, %v325_v22  ;;  %v346_v34 = vsub.f32 %v1476_v43, %v203_v45 }
  0x21   :  { %1115 = vmatprep.subr.bf16.mxu1 %v1441_v31  ;;  %v272_v58 = vand.u32 4294901760, %v271_v54  ;;  %v279_v59 = vand.u32 4294901760, %v278_v55  ;;  %v1525_v63 = vpack.c.bf16 %v291_v61, %v284_v60  ;;  %v1568_v43 = vpack.c.bf16 %v1497_v48, %v1494_v47 }
  0x22   :  { %1275 = vset.pattern.permute.xlu1 %v1336_v12  ;;  %v327_v32 = vsub.f32 %v325_v22, %v326_v28  ;;  %v347_v40 = vand.u32 4294901760, %v346_v34  ;;  %v43_v47 = vlaneseq }
  0x23   :  { %100 = vperm.xlu1 %1275, %v97_v10   ;;  %1273 = vset.pattern.permute.xlu0 %v1335_v1  ;;  %v1523_v62 = vpack.c.bf16 %v279_v59, %v272_v58  ;;  %v292_v1 = vsub.f32 %v290_v57, %v291_v61  ;;  %v318_v10 = vsub.f32 %v1447_v33, %v191_v35 }
  0x24   :  { %64 = vperm.xlu0 %1273, %v1399_v11   ;;  %1189 = vmatpush3.bf16.msra.mxu0 %v1441_v31  ;;  %v339_v33 = vsub.f32 %v1474_v42, %v200_v44  ;;  %v328_v39 = vand.u32 4294901760, %v327_v32  ;;  %v348_v55 = vsub.f32 %v346_v34, %v347_v40  ;;  %v1570_v44 = vpack.c.bf16 %v290_v57, %v283_v56 }
  0x25   :  { %1117 = vmatpush3.bf16.msra.mxu1 %v1441_v31  ;;  %1191 = vmatprep.subr.bf16.mxu0 %v1454_v36  ;;  %v293_v5 = vand.u32 4294901760, %v292_v1  ;;  %v319_v15 = vand.u32 4294901760, %v318_v10  ;;  %v1574_v61 = vpack.c.bf16 %v318_v10, %v311_v9  ;;  %v44_v57 = vand.u32 127, %v43_v47 }
  0x26   :  { %1119 = vmatprep.subr.bf16.mxu1 %v1454_v36  ;;  %v340_v38 = vand.u32 4294901760, %v339_v33  ;;  %v1578_v1 = vpack.c.bf16 %v346_v34, %v339_v33 }
  0x27   :  { %1276 = vset.pattern.permute.xlu1 %v1334_v0  ;;  %v285_v0 = vsub.f32 %v283_v56, %v284_v60  ;;  %v349_v60 = vand.u32 4294901760, %v348_v55 }
  0x28   :  { %90 = vperm.xlu1 %1276, %v1399_v11   ;;  %1278 = vset.pattern.permute.xlu0 %v1336_v12  ;;  %v1560_v52 = vpack.c.bf16 %v347_v40, %v340_v38  ;;  %v341_v54 = vsub.f32 %v339_v33, %v340_v38 }
  0x29   :  { %112 = vperm.xlu0 %1278, %v1383_v2   ;;  %1193 = vmatpush3.bf16.msra.mxu0 %v1454_v36  ;;  %v286_v4 = vand.u32 4294901760, %v285_v0  ;;  %v1576_v0 = vpack.c.bf16 %v332_v24, %v325_v22 }
  0x2a   :  { %1121 = vmatpush3.bf16.msra.mxu1 %v1454_v36  ;;  %1195 = vmatprep.subr.bf16.mxu0 %v1471_v41  ;;  %v342_v59 = vand.u32 4294901760, %v341_v54 }
  0x2b   :  { %1123 = vmatprep.subr.bf16.mxu1 %v1471_v41  ;;  %v1534_v8 = vpack.c.bf16 %v293_v5, %v286_v4 }
  0x2c   :  { %1277 = vset.pattern.permute.xlu1 %v1336_v12  ;;  %v1564_v42 = vpack.c.bf16 %v349_v60, %v342_v59 }
  0x2d   :  { %103 = vperm.xlu1 %1277, %v98_v13   ;;  %1281 = vset.pattern.permute.xlu0 %v1337_v19  ;;  %v306_v13 = vsub.f32 %v304_v3, %v305_v7 }
  0x2e   :  { %129 = vperm.xlu0 %1281, %v124_v14   ;;  %1197 = vmatpush3.bf16.msra.mxu0 %v1471_v41  ;;  %v312_v14 = vand.u32 4294901760, %v311_v9 }
  0x2f   :  { %1125 = vmatpush3.bf16.msra.mxu1 %v1471_v41  ;;  %1199 = vmatprep.subr.bf16.mxu0 %v1488_v46  ;;  %v307_v17 = vand.u32 4294901760, %v306_v13 }
  0x30   :  { %1127 = vmatprep.subr.bf16.mxu1 %v1488_v46  ;;  %v1540_v18 = vpack.c.bf16 %v319_v15, %v312_v14 }
  0x31   :  { %1279 = vset.pattern.permute.xlu1 %v1337_v19 }
  0x32   :  { %126 = vperm.xlu1 %1279, %v123_v20   ;;  %1201 = vmatpush3.bf16.msra.mxu0 %v1488_v46  ;;  %v320_v20 = vsub.f32 %v318_v10, %v319_v15 }
  0x33   :  { %1129 = vmatpush3.bf16.msra.mxu1 %v1488_v46  ;;  %1043 = vmatprep.subr.mxu0 %v1503_v50 }
  0x34   :  { %956 = vmatprep.subr.mxu1 %v1503_v50 }
  0x36   :  { %1280 = vset.pattern.permute.xlu1 %v1336_v12  ;;  %1044 = vmatpush3.msra.mxu0 %v1503_v50 }
  0x37   :  { %116 = vperm.xlu1 %1280, %v1399_v11   ;;  %1203 = vmatprep.subr.bf16.mxu0 %v1509_v53 }
  0x38   :  { %957 = vmatpush3.msra.mxu1 %v1503_v50 }
  0x39   :  { %1131 = vmatprep.subr.bf16.mxu1 %v1523_v62 }
  0x3b   :  { %1282 = vset.pattern.permute.xlu1 %v1337_v19  ;;  %v313_v19 = vsub.f32 %v311_v9, %v312_v14 }
  0x3c   :  { %138 = vperm.xlu1 %1282, %v1383_v2   ;;  %v297_v2 = vsub.f32 %v1428_v27, %v182_v29  ;;  %v321_v27 = vand.u32 4294901760, %v320_v20  ;;  %v333_v29 = vand.u32 4294901760, %v332_v24 }
  0x3d   :  { %v314_v25 = vand.u32 4294901760, %v313_v19 }
  0x3e   :  { %v298_v6 = vand.u32 4294901760, %v297_v2  ;;  %v1558_v35 = vpack.c.bf16 %v333_v29, %v326_v28  ;;  %v334_v37 = vsub.f32 %v332_v24, %v333_v29  ;;  %v1572_v45 = vpack.c.bf16 %v304_v3, %v297_v2 }
  0x3f   :  { %v1550_v30 = vpack.c.bf16 %v321_v27, %v314_v25  ;;  %v1338_v3 = vmov 0.0  }
  0x40   :  { %142 = vperm.xlu1 %1282, %v1399_v11   ;;  %v1538_v11 = vpack.c.bf16 %v305_v7, %v298_v6  ;;  %v299_v12 = vsub.f32 %v297_v2, %v298_v6  ;;  %v335_v51 = vand.u32 4294901760, %v334_v37 }
  0x42   :  { %v300_v16 = vand.u32 4294901760, %v299_v12  ;;  %v1562_v58 = vpack.c.bf16 %v335_v51, %v328_v39 }
  0x44   :  { %v1545_v23 = vpack.c.bf16 %v307_v17, %v300_v16 }
  0x94   :  { %v60_v4 = vpop.permute.xlu1 %59  ;;  %v87_v6 = vpop.permute.xlu0 %86 }
  0x98   :  { %v50_v5 = vpop.permute.xlu1 %49 }
  0x99   :  { %v47_v12 = vpop.permute.xlu0 %46  ;;  %vm52_vm4 = vcmp.eq.s32.totalorder %v44_v57, %v50_v5 }
  0x9a   :  { %vm51_vm1 = vcmp.eq.s32.totalorder %v44_v57, %v47_v12  ;;  %v835_v32 = vsel %vm52_vm4, 1.0, %v1338_v3 }
  0x9b   :  { %v834_v16 = vsel %vm51_vm1, 1.0, %v1338_v3 }
  0x9c   :  { %v67_v24 = vmul.f32 %v834_v16, %v60_v4 }
  0x9d   :  { %v78_v7 = vpop.permute.xlu1 %77 }
  0x9e   :  { %v75_v14 = vpop.permute.xlu0 %74  ;;  %vm80_vm3 = vcmp.eq.s32.totalorder %v44_v57, %v78_v7 }
  0x9f   :  { %vm79_vm0 = vcmp.eq.s32.totalorder %v44_v57, %v75_v14  ;;  %v837_v27 = vsel %vm80_vm3, 1.0, %v1338_v3 }
  0xa0   :  { %v836_v9 = vsel %vm79_vm0, 1.0, %v1338_v3 }
  0xa1   :  { %v93_v17 = vmul.f32 %v836_v9, %v87_v6 }
  0xa2   :  { %v101_v13 = vpop.permute.xlu1 %100 }
  0xa3   :  { %v65_v56 = vpop.permute.xlu0 %64  ;;  %vm105_vm2 = vcmp.eq.s32.totalorder %v44_v57, %v101_v13  ;;  %v95_v29 = vadd.f32 %v93_v17, %v67_v24 }
  0xa4   :  { %v838_v20 = vsel %vm105_vm2, 1.0, %v1338_v3  ;;  %v68_v39 = vmul.f32 %v835_v32, %v65_v56 }
  0xa7   :  { %v91_v15 = vpop.permute.xlu1 %90 }
  0xa8   :  { %v113_v10 = vpop.permute.xlu0 %112  ;;  %v94_v28 = vmul.f32 %v837_v27, %v91_v15 }
  0xa9   :  { %v119_v25 = vmul.f32 %v838_v20, %v113_v10 }
  0xaa   :  { %v96_v55 = vadd.f32 %v94_v28, %v68_v39 }
  0xab   :  { %v121_v38 = vadd.f32 %v119_v25, %v95_v29 }
  0xac   :  { %v104_v48 = vpop.permute.xlu1 %103 }
  0xad   :  { %v130_v22 = vpop.permute.xlu0 %129  ;;  %vm106_vm5 = vcmp.eq.s32.totalorder %v44_v57, %v104_v48 }
  0xae   :  { %vm132_vm7 = vcmp.eq.s32.totalorder %v44_v57, %v130_v22  ;;  %v839_v33 = vsel %vm106_vm5, 1.0, %v1338_v3 }
  0xaf   :  { %v841_v54 = vsel %vm132_vm7, 1.0, %v1338_v3 }
  0xb1   :  { %v127_v2 = vpop.permute.xlu1 %126 }
  0xb2   :  { %vm131_vm6 = vcmp.eq.s32.totalorder %v44_v57, %v127_v2 }
  0xb3   :  { %v840_v34 = vsel %vm131_vm6, 1.0, %v1338_v3 }
  0xb6   :  { %v117_v19 = vpop.permute.xlu1 %116 }
  0xb7   :  { %v120_v40 = vmul.f32 %v839_v33, %v117_v19 }
  0xb9   :  { %v122_v4 = vadd.f32 %v120_v40, %v96_v55 }
  0xbb   :  { %v139_v37 = vpop.permute.xlu1 %138 }
  0xbc   :  { %v145_v51 = vmul.f32 %v840_v34, %v139_v37 }
  0xbe   :  { %v147_v59 = vadd.f32 %v145_v51, %v121_v38 }
  0xbf   :  { %v143_v60 = vpop.permute.xlu1 %142 }
  0xc0   :  { %v164_v5 = vsel %vm162_vm8, %v147_v59, 0  ;;  %v146_v6 = vmul.f32 %v841_v54, %v143_v60 }
  0xc1   :  { %v247_v7 = vand.u32 4294901760, %v164_v5 }
  0xc2   :  { %v148_v12 = vadd.f32 %v146_v6, %v122_v4 }
  0xc3   :  { %v248_v13 = vsub.f32 %v164_v5, %v247_v7 }
  0xc4   :  { %v167_v14 = vsel %vm162_vm8, %v148_v12, 0 }
  0xc5   :  { %v1580_v15 = vand.u32 4294901760, %v167_v14  ;;  %v249_v47 = vand.u32 4294901760, %v248_v13 }
  0xc7   :  { %v1583_v48 = vsub.f32 %v167_v14, %v1580_v15  ;;  %1045 = vmatprep.mubr.f32.mxu0 %v249_v47  ;;  %v250_v56 = vsub.f32 %v248_v13, %v249_v47 }
  0xc9   :  { %v251_v57 = vand.u32 4294901760, %v250_v56  ;;  %v259_v2 = vand.u32 4294901760, %v1583_v48 }
  0xcb   :  { %958 = vmatprep.mubr.f32.mxu1 %v251_v57  ;;  %1046 = vmatmul.mubr.f32.vlgmr.msra.gmra.mrb[0].mxu0 %v259_v2  ;;  %v260_v3 = vsub.f32 %v1583_v48, %v259_v2 }
  0xcc   :  { %1205 = vmatpush3.bf16.msra.mxu0 %v1509_v53  ;;  %1074 = vmatprep.mubr.f32.mxu0 %v247_v7  ;;  %v353_v53 = vsub.f32 %v1500_v49, %v1503_v50 }
  0xcd   :  { %1207 = vmatprep.subr.bf16.mxu0 %v1525_v63  ;;  %v261_v9 = vand.u32 4294901760, %v260_v3 }
  0xcf   :  { %959 = vmatmul.mubr.f32.vlgmr.msra.gmra.mrb[0].mxu1 %v261_v9 }
  0xd0   :  { %1133 = vmatpush3.bf16.msra.mxu1 %v1523_v62  ;;  %1209 = vmatpush3.bf16.msra.mxu0 %v1525_v63  ;;  %v354_v62 = vand.u32 4294901760, %v353_v53 }
  0xd1   :  { %987 = vmatprep.mubr.f32.mxu1 %v247_v7  ;;  %1135 = vmatprep.subr.bf16.mxu1 %v1534_v8 }
  0xd2   :  { %1211 = vmatprep.subr.bf16.mxu0 %v1538_v11  ;;  %v355_v63 = vsub.f32 %v353_v53, %v354_v62 }
  0xd4   :  { %1137 = vmatpush3.bf16.msra.mxu1 %v1534_v8  ;;  %1213 = vmatpush3.bf16.msra.mxu0 %v1538_v11  ;;  %v356_v49 = vand.u32 4294901760, %v355_v63 }
  0xd5   :  { %1139 = vmatprep.subr.bf16.mxu1 %v1545_v23  ;;  %1215 = vmatprep.subr.bf16.mxu0 %v1540_v18 }
  0xd8   :  { %1141 = vmatpush3.bf16.msra.mxu1 %v1545_v23  ;;  %1217 = vmatpush3.bf16.msra.mxu0 %v1540_v18 }
  0xd9   :  { %1143 = vmatprep.subr.bf16.mxu1 %v1550_v30  ;;  %1219 = vmatprep.subr.bf16.mxu0 %v1558_v35 }
  0xdc   :  { %1145 = vmatpush3.bf16.msra.mxu1 %v1550_v30  ;;  %1221 = vmatpush3.bf16.msra.mxu0 %v1558_v35 }
  0xdd   :  { %1147 = vmatprep.subr.bf16.mxu1 %v1562_v58  ;;  %1223 = vmatprep.subr.bf16.mxu0 %v1560_v52 }
  0xe0   :  { %1149 = vmatpush3.bf16.msra.mxu1 %v1562_v58  ;;  %1225 = vmatpush3.bf16.msra.mxu0 %v1560_v52 }
  0xe1   :  { %1151 = vmatprep.subr.bf16.mxu1 %v1564_v42  ;;  %1072 = vmatprep.subr.mxu0 %v354_v62 }
  0xe4   :  { %1153 = vmatpush3.bf16.msra.mxu1 %v1564_v42  ;;  %1073 = vmatpush3.msra.mxu0 %v354_v62 }
  0xe5   :  { %1075 = vmatmul.mubr.f32.vlgmr.msra.gmra.mrb[0].mxu0 %v1580_v15  ;;  %1227 = vmatprep.subr.bf16.mxu0 %v1410_v21 }
  0xe6   :  { %1229 = vmatpush3.bf16.msra.mxu0 %v1410_v21  ;;  %1103 = vmatprep.mubr.f32.mxu0 %v247_v7 }
  0xe7   :  { %985 = vmatprep.subr.mxu1 %v356_v49  ;;  %1231 = vmatprep.subr.bf16.mxu0 %v1425_v26 }
  0xe8   :  { %986 = vmatpush3.msra.mxu1 %v356_v49 }
  0xe9   :  { %988 = vmatmul.mubr.f32.vlgmr.msra.gmra.mrb[0].mxu1 %v1580_v15  ;;  %1155 = vmatprep.subr.bf16.mxu1 %v1568_v43 }
  0xea   :  { %1157 = vmatpush3.bf16.msra.mxu1 %v1568_v43  ;;  %1016 = vmatprep.mubr.f32.mxu1 %v248_v13 }
  0xeb   :  { %1233 = vmatpush3.bf16.msra.mxu0 %v1425_v26  ;;  %1159 = vmatprep.subr.bf16.mxu1 %v1570_v44 }
  0xec   :  { %1235 = vmatprep.subr.bf16.mxu0 %v1441_v31 }
  0xee   :  { %1161 = vmatpush3.bf16.msra.mxu1 %v1570_v44 }
  0xef   :  { %1237 = vmatpush3.bf16.msra.mxu0 %v1441_v31  ;;  %1163 = vmatprep.subr.bf16.mxu1 %v1572_v45 }
  0xf0   :  { %1239 = vmatprep.subr.bf16.mxu0 %v1454_v36 }
  0xf2   :  { %1165 = vmatpush3.bf16.msra.mxu1 %v1572_v45 }
  0xf3   :  { %1241 = vmatpush3.bf16.msra.mxu0 %v1454_v36  ;;  %1167 = vmatprep.subr.bf16.mxu1 %v1574_v61 }
  0xf4   :  { %1243 = vmatprep.subr.bf16.mxu0 %v1471_v41 }
  0xf6   :  { %1169 = vmatpush3.bf16.msra.mxu1 %v1574_v61 }
  0xf7   :  { %1245 = vmatpush3.bf16.msra.mxu0 %v1471_v41  ;;  %1171 = vmatprep.subr.bf16.mxu1 %v1576_v0 }
  0xf8   :  { %1247 = vmatprep.subr.bf16.mxu0 %v1488_v46 }
  0xfa   :  { %1173 = vmatpush3.bf16.msra.mxu1 %v1576_v0 }
  0xfb   :  { %1249 = vmatpush3.bf16.msra.mxu0 %v1488_v46  ;;  %1175 = vmatprep.subr.bf16.mxu1 %v1578_v1 }
  0xfc   :  { %1101 = vmatprep.subr.mxu0 %v1503_v50 }
  0xfe   :  { %1177 = vmatpush3.bf16.msra.mxu1 %v1578_v1 }
  0xff   :  { %1102 = vmatpush3.msra.mxu0 %v1503_v50  ;;  %1014 = vmatprep.subr.mxu1 %v353_v53 }
 0x100   :  { %1104 = vmatmul.mubr.f32.vlgmr.msra.gmra.mrb[0].mxu0 %v1580_v15 }
 0x102   :  { %1015 = vmatpush3.msra.mxu1 %v353_v53 }
 0x103   :  { %1017 = vmatmul.mubr.f32.vlgmr.msra.gmra.mrb[0].mxu1 %v1583_v48 }
 0x1d3   :  { %v1105_v21 = vpop.f32.mrb[0].mxu0 }
 0x1d4   :  { %v804_v26 = vpop.f32.mrb[1].mxu0 }
 0x1d6   :  { %v1018_v31 = vpop.f32.mrb[0].mxu1 }
 0x1d7   :  { %v1250_v36 = vadd.f32 %v1105_v21, %v1018_v31  ;;  %v503_v41 = vpop.f32.mrb[1].mxu1 }
 0x1d8   :  { %v1251_v46 = vadd.f32 %v804_v26, %v503_v41 }
 0x1d9   :  { %815 = vst [vmem:[#allocation5 + $0x8] sm:$0xff] %v1250_v36 }
 0x1da   :  { %814 = vst [vmem:[#allocation5] sm:$0xff] %v1251_v46 }
 0x1db   :  { %1316 = shalt.err (!%p1313_p12)
}
 0x1dc   :  { %s1317_s14 = scalar_lea.hbm %s1660_s4, 256 }
 0x1dd   :  { %p1318_p13 = scmp.ne.s32.totalorder %s1660_s4, %s1317_s14  ;;  %p1321_p0 = scmp.lt.u32.totalorder %s1317_s14, %s1660_s4 }
 0x1df   :  { %p1323_p1 = pnand %p1321_p0, %p1318_p13 }
 0x1e1   :  { %1326 = shalt.err (!%p1323_p1)
}
 0x1e2   :  { %827 = dma.vmem_to_hbm [thread:$0]  %s822_s1, 256, %s1660_s4, [#allocation4], %s1332_s25, %s1332_s25, %s1333_s26  }
 0x1e3   :  { %1329 = dma.done.wait [#allocation4], 256  }
 0x1e4   :  { %1330 = vsyncadd [#allocation4], 4294967040 }
 0x1e5   :  { %831 = vsyncpa [#allocation3], 1 }
 0x1e6   :  { %832 = vsyncpa [#allocation4], 1 }

</bundles_post_ra>
